<compile_context>
chip_gen: v5e
topology: v5e:2x2
jax: 0.10.0
libtpu: 0.0.40
codegen_flags: <defaults>
</compile_context>

<pallas_src>
import functools
import math

import jax
import jax.numpy as jnp
from jax.experimental import pallas as pl
from jax.experimental.pallas import tpu as pltpu


# ----------------------------- struct mixing (glue) --------------------------

def _split4(x, L):
    return [x[:, i * L:(i + 1) * L] for i in range(4)]


def _get_hr(head, rela, struct, n_dim):
    """Faithful port of KGEModule.get_hr (struct is a static Python tuple)."""
    idx = tuple(struct)
    L = n_dim // 4
    hs = _split4(head, L)
    rs = _split4(rela, L)
    vs = [None, None, None, None]
    vs[idx[0]] = hs[0] * rs[0]
    vs[idx[1]] = hs[1] * rs[1]
    vs[idx[2]] = hs[2] * rs[2]
    vs[idx[3]] = hs[3] * rs[3]
    res_B = (len(idx) - 4) // 4
    for b_ in range(1, res_B + 1):
        base = 4 * b_
        vs[idx[base + 2]] = vs[idx[base + 2]] + (
            rs[idx[base + 0]] * hs[idx[base + 1]] * float(int(idx[base + 3])))
    return jnp.concatenate(vs, axis=1)


def _get_rt(rela, tail, struct, n_dim):
    """Faithful port of KGEModule.get_rt."""
    idx = tuple(struct)
    L = n_dim // 4
    ts = _split4(tail, L)
    rs = _split4(rela, L)
    vs = [rs[0] * ts[idx[0]], rs[1] * ts[idx[1]],
          rs[2] * ts[idx[2]], rs[3] * ts[idx[3]]]
    res_B = (len(idx) - 4) // 4
    for b_ in range(1, res_B + 1):
        base = 4 * b_
        vs[idx[base + 1]] = vs[idx[base + 1]] + (
            rs[idx[base + 0]] * ts[idx[base + 2]] * float(int(idx[base + 3])))
    return jnp.concatenate(vs, axis=1)


# ------------------------------- kernel ---------------------------------------

def kge_lse_kernel(lhs_ref, ent_ref, max_ref, logl_ref, m_acc, l_acc, *,
                   n_ent, tile_e, e_blocks_per_split, need_mask, acc_lanes):
    """Streams lane-dense entity tiles; online max / sum-exp per batch row.

    lhs_ref : (2*tile_b, n_dim)   stacked [vec_hr block ; vec_rt block]
    ent_ref : (n_dim, tile_e)     transposed entity tile (lane-dense)
    outputs : (1, 2*tile_b, 1)    running max / log(sum exp(. - max)) per split
    """
    e = pl.program_id(2)

    @pl.when(e == 0)
    def _init():
        m_acc[...] = jnp.full(m_acc.shape, -jnp.inf, jnp.float32)
        l_acc[...] = jnp.zeros(l_acc.shape, jnp.float32)

    lhs = lhs_ref[...]
    ent = ent_ref[...]

    # One MXU push per entity tile scores BOTH the tail (hr rows) and head
    # (rt rows) candidates.  Standard NN contraction: K = n_dim sits on the
    # sublanes of the transposed entity tile.
    s = jax.lax.dot_general(lhs, ent, (((1,), (0,)), ((), ())),
                            preferred_element_type=jnp.float32)

    if need_mask:  # static: padded entity columns only exist in the last global tile
        g_blk = pl.program_id(0) * e_blocks_per_split + e
        col = jax.lax.broadcasted_iota(jnp.int32, s.shape, 1)
        s = jnp.where(g_blk * tile_e + col < n_ent, s, jnp.float32(-1e30))

    # Online log-sum-exp.  Row max stays a per-step cross-lane reduce (its XLU
    # cost is minor; a fully per-lane max would double the EUP exp count via
    # per-lane rescales).  The sum accumulator is lane-dense (rows, 128) and is
    # only reduced across lanes once, in the finalize.
    m_old = m_acc[...]
    m_new = jnp.maximum(m_old, jnp.max(s, axis=1, keepdims=True))
    p = jnp.exp(s - m_new)                       # EUP
    l = l_acc[...] * jnp.exp(m_old - m_new)      # per-row rescale (cheap)
    if acc_lanes == 128:
        for k in range(tile_e // 128):           # static, unrolled; pure VPU adds
            l = l + p[:, k * 128:(k + 1) * 128]
    else:                                        # tile_e == n_ent, not 128-aligned
        l = l + jnp.sum(p, axis=1, keepdims=True)
    l_acc[...] = l
    m_acc[...] = m_new

    @pl.when(e == pl.num_programs(2) - 1)
    def _finalize():
        max_ref[...] = m_acc[...][None]
        logl_ref[...] = jnp.log(jnp.sum(l_acc[...], axis=1, keepdims=True))[None]


# ------------------------------- tiling helpers --------------------------------

def _round_up(x, m):
    return ((x + m - 1) // m) * m


def _vmem_caps():
    """Generation-aware VMEM limits (v7x: 64 MiB physical, v5e/v6e: 128 MiB)."""
    phys = None
    try:
        phys = getattr(pltpu.get_tpu_info(), "vmem_capacity_bytes", None)
    except Exception:
        phys = None
    if not phys:
        phys = 64 << 20                       # conservative fallback (v7x-safe)
    limit = min(int(phys) * 3 // 4, 112 << 20)  # ~48 MiB on v7x, ~96 MiB on v5e/v6e
    budget = limit // 2                         # budget used by the tile picker
    return limit, budget


def _pick_tiles(B, n_ent, n_dim, itemsize, budget_bytes, tile_b=None, tile_e=None):
    """Pick (tile_b, tile_e).  Bias: maximize tile_b first (fewer table passes)."""
    if tile_b is None:
        tile_b = min(_round_up(B, 8), 512)
    else:
        tile_b = max(8, _round_up(tile_b, 8))

    nd_lane = _round_up(n_dim, 128)   # lane footprint of n_dim on the stacked LHS
    nd_sub = _round_up(n_dim, 8)      # sublane footprint of n_dim on the ent tile

    def max_tile_e(tb):
        lhs = 2 * (2 * tb) * nd_lane * itemsize            # double-buffered LHS block
        accs = (2 * tb) * 128 * 4 * 4                       # m/l accumulators + outputs
        per_col = 2 * nd_sub * itemsize + 3 * (2 * tb) * 4  # dbl-buf ent cols + s/p temps
        return max(budget_bytes - lhs - accs, 0) // per_col

    if tile_e is None:
        cap = max_tile_e(tile_b)
        while tile_b > 128 and cap < 256:     # only shrink tile_b if tile_e gets tiny
            tile_b = max(128, (tile_b // 2) // 8 * 8)
            cap = max_tile_e(tile_b)
        if cap >= _round_up(n_ent, 128):
            tile_e = n_ent                    # whole table in one tile: no pad, no mask
        else:
            tile_e = int(min(max(cap, 128), 8192)) // 128 * 128
            tile_e = max(tile_e, 128)
    else:
        if tile_e != n_ent:                   # BlockSpec lane dim must be 128-aligned
            tile_e = max(128, (int(tile_e) // 128) * 128)
    return tile_b, tile_e


# ------------------------------- wrapper ---------------------------------------

def kge_forward(head_idx, tail_idx, rela_idx, ent_w, rel_w, struct, *,
                ent_w_t=None, tile_b=None, tile_e=None):
    """Matches KGEModule.forward: returns (loss, regul).

    ent_w_t: optional pre-transposed (n_dim, n_ent) entity table (bf16 OK);
    pass it persistently in production to avoid the per-call transpose copy.
    """
    head_idx = head_idx.reshape(-1)
    tail_idx = tail_idx.reshape(-1)
    rela_idx = rela_idx.reshape(-1)
    B = head_idx.shape[0]
    n_ent, n_dim = ent_w.shape

    # ----- cheap glue in plain JAX, always in f32 (gathers, mixing, regul) -----
    head_e = ent_w[head_idx].astype(jnp.float32)
    tail_e = ent_w[tail_idx].astype(jnp.float32)
    rela_e = rel_w[rela_idx].astype(jnp.float32)
    vec_hr = _get_hr(head_e, rela_e, struct, n_dim)          # (B, n_dim) f32
    vec_rt = _get_rt(rela_e, tail_e, struct, n_dim)          # (B, n_dim) f32
    pos_trip = jnp.sum(vec_hr * tail_e, axis=1)              # (B,)
    regul = jnp.sum(rela_e ** 2)                             # scalar

    # ----- tiling -----
    vmem_limit, vmem_budget = _vmem_caps()
    itemsize = jnp.dtype(ent_w.dtype).itemsize
    tile_b, tile_e = _pick_tiles(B, n_ent, n_dim, itemsize, vmem_budget,
                                 tile_b, tile_e)

    b_pad = _round_up(B, tile_b)
    b_blocks = b_pad // tile_b
    e_pad = _round_up(n_ent, tile_e)
    e_blocks = e_pad // tile_e
    need_mask = (e_pad != n_ent)
    acc_lanes = 128 if tile_e % 128 == 0 else 1

    # With a single batch block, split the entity range 2-way on a leading
    # "parallel" grid axis so v7x's second TensorCore has work (partial LSEs
    # are combined exactly below); negligible cost on single-core chips.
    ent_splits = 2 if (b_blocks == 1 and e_blocks >= 2 and e_blocks % 2 == 0) else 1
    e_per_split = e_blocks // ent_splits

    # ----- stacked LHS: [hr block ; rt block] per batch block -----
    op_dtype = ent_w.dtype               # bf16 table -> bf16 MXU operands
    hr = vec_hr.astype(op_dtype)
    rt = vec_rt.astype(op_dtype)
    if b_pad != B:
        hr = jnp.pad(hr, ((0, b_pad - B), (0, 0)))
        rt = jnp.pad(rt, ((0, b_pad - B), (0, 0)))
    lhs = jnp.concatenate(
        [hr.reshape(b_blocks, tile_b, n_dim), rt.reshape(b_blocks, tile_b, n_dim)],
        axis=1).reshape(b_blocks * 2 * tile_b, n_dim)

    # ----- transposed, lane-dense entity table -----
    if ent_w_t is None:
        # TODO(synk): store the entity table persistently as (n_dim, n_ent)
        # (padded to a tile_e multiple) so this transpose/pad copy is not paid
        # on every forward call.
        ent_w_t = ent_w.T
    ent_t = ent_w_t
    if need_mask:
        ent_t = jnp.pad(ent_t, ((0, 0), (0, e_pad - n_ent)))

    kernel = functools.partial(
        kge_lse_kernel, n_ent=n_ent, tile_e=tile_e,
        e_blocks_per_split=e_per_split, need_mask=need_mask, acc_lanes=acc_lanes)

    out_sds = jax.ShapeDtypeStruct((ent_splits, 2 * b_pad, 1), jnp.float32)
    out_spec = pl.BlockSpec((1, 2 * tile_b, 1), lambda s, b, e: (s, b, 0))

    m_out, logl_out = pl.pallas_call(
        kernel,
        out_shape=(out_sds, out_sds),
        grid_spec=pltpu.PrefetchScalarGridSpec(
            num_scalar_prefetch=0,
            grid=(ent_splits, b_blocks, e_per_split),
            in_specs=[
                pl.BlockSpec((2 * tile_b, n_dim), lambda s, b, e: (b, 0)),
                pl.BlockSpec((n_dim, tile_e),
                             lambda s, b, e: (0, s * e_per_split + e)),
            ],
            out_specs=(out_spec, out_spec),
            scratch_shapes=[pltpu.VMEM((2 * tile_b, 1), jnp.float32),
                            pltpu.VMEM((2 * tile_b, acc_lanes), jnp.float32)],
        ),
        compiler_params=pltpu.CompilerParams(
            dimension_semantics=("parallel", "parallel", "arbitrary"),
            vmem_limit_bytes=vmem_limit),
    )(lhs, ent_t)

    # ----- combine partial (max, log-sum) across entity splits, split t/h -----
    m3 = m_out[..., 0].reshape(ent_splits, b_blocks, 2, tile_b)
    l3 = logl_out[..., 0].reshape(ent_splits, b_blocks, 2, tile_b)
    M = jnp.max(m3, axis=0)                                   # global max per row
    logsum = jnp.log(jnp.sum(jnp.exp(l3 + m3 - M[None]), axis=0))

    max_t = M[:, 0, :].reshape(b_pad, 1)[:B]                  # (B, 1)
    max_h = M[:, 1, :].reshape(b_pad, 1)[:B]                  # (B, 1)
    ls_t = logsum[:, 0, :].reshape(b_pad)[:B]                 # (B,)
    ls_h = logsum[:, 1, :].reshape(b_pad)[:B]                 # (B,)

    # Exactly the PyTorch broadcasting: (B,) + (B,1) + (B,) + (B,1) + (B,)
    # -> (B, B), then sum (i.e. B * per-row loss), mirroring the reference.
    loss = -2.0 * pos_trip + max_t + ls_t + max_h + ls_h
    return jnp.sum(loss), regul


# ----------------------------- pure-JAX reference -------------------------------

def kge_forward_ref(head_idx, tail_idx, rela_idx, ent_w, rel_w, struct):
    head_e = ent_w[head_idx.reshape(-1)]
    tail_e = ent_w[tail_idx.reshape(-1)]
    rela_e = rel_w[rela_idx.reshape(-1)]
    n_dim = ent_w.shape[1]
    vec_hr = _get_hr(head_e, rela_e, struct, n_dim)
    vec_rt = _get_rt(rela_e, tail_e, struct, n_dim)
    pos_trip = jnp.sum(vec_hr * tail_e, axis=1)
    neg_tail = vec_hr @ ent_w.T
    neg_head = vec_rt @ ent_w.T
    max_t = jnp.max(neg_tail, axis=1, keepdims=True)
    max_h = jnp.max(neg_head, axis=1, keepdims=True)
    loss = (-2.0 * pos_trip + max_t
            + jnp.log(jnp.sum(jnp.exp(neg_tail - max_t), axis=1))
            + max_h
            + jnp.log(jnp.sum(jnp.exp(neg_head - max_h), axis=1)))
    return jnp.sum(loss), jnp.sum(rela_e ** 2)


# --------------------------------- main ------------------------------------------

def _xavier_uniform(key, shape):
    fan_out, fan_in = shape
    a = math.sqrt(6.0 / (fan_in + fan_out))
    return jax.random.uniform(key, shape, jnp.float32, minval=-a, maxval=a)


if __name__ == "__main__":
    n_ent, n_rel, n_dim, B = 1000, 16, 32, 20
    # struct: first 4 entries permute the 4 n_dim/4 blocks; one residual block
    # (base=4): vs[struct[6]] += r[struct[4]] * h_or_t[struct[5]] * struct[7].
    struct = (0, 2, 1, 3, 1, 0, 3, 2)

    key = jax.random.PRNGKey(0)
    k_ent, k_rel, k_h, k_t, k_r = jax.random.split(key, 5)

    ent_w = _xavier_uniform(k_ent, (n_ent, n_dim))
    rel_w = _xavier_uniform(k_rel, (n_rel, n_dim))

    head_idx = jax.random.randint(k_h, (B,), 0, n_ent, dtype=jnp.int32)
    tail_idx = jax.random.randint(k_t, (B,), 0, n_ent, dtype=jnp.int32)
    rela_idx = jax.random.randint(k_r, (B,), 0, n_rel, dtype=jnp.int32)

    loss_ref, regul_ref = kge_forward_ref(
        head_idx, tail_idx, rela_idx, ent_w, rel_w, struct)

    # 1) Forced small entity tile: exercises multi-tile streaming, the online
    #    LSE, the last-tile mask (1000 -> 1024), the 2-way entity split combine
    #    and batch padding (B=20 -> 24).
    fwd_tiled = jax.jit(functools.partial(kge_forward, struct=struct, tile_e=256))
    loss, regul = fwd_tiled(head_idx, tail_idx, rela_idx, ent_w, rel_w)
    jax.block_until_ready((loss, regul))
    assert jnp.allclose(loss, loss_ref, rtol=1e-3, atol=1e-3), (loss, loss_ref)
    assert jnp.allclose(regul, regul_ref, rtol=1e-3, atol=1e-3), (regul, regul_ref)

    # 2) Auto tiling: whole table in a single lane-dense tile (no pad, no mask).
    fwd_auto = jax.jit(functools.partial(kge_forward, struct=struct))
    loss2, regul2 = fwd_auto(head_idx, tail_idx, rela_idx, ent_w, rel_w)
    jax.block_until_ready((loss2, regul2))
    assert jnp.allclose(loss2, loss_ref, rtol=1e-3, atol=1e-3), (loss2, loss_ref)
    assert jnp.allclose(regul2, regul_ref, rtol=1e-3, atol=1e-3), (regul2, regul_ref)

    print("KERNEL_OK")
</pallas_src>

<mosaic_0001>
module attributes {stable_mosaic.version = 11 : i64} {
  func.func @kge_lse_kernel(%arg0: i32, %arg1: i32, %arg2: i32, %arg3: memref<48x32xf32, #tpu.memory_space<vmem>>, %arg4: memref<32x256xf32, #tpu.memory_space<vmem>>, %arg5: memref<1x48x1xf32, #tpu.memory_space<vmem>>, %arg6: memref<1x48x1xf32, #tpu.memory_space<vmem>>, %arg7: memref<48x1xf32, #tpu.memory_space<vmem>>, %arg8: memref<48x128xf32, #tpu.memory_space<vmem>>) attributes {dimension_semantics = [#tpu.dimension_semantics<parallel>, #tpu.dimension_semantics<parallel>, #tpu.dimension_semantics<arbitrary>], iteration_bounds = array<i64: 2, 1, 2>, scalar_prefetch = 0 : i64, scratch_operands = 2 : i64, tpu.core_type = #tpu.core_type<tc>, window_params = [{transform_indices = @transform_0, window_bounds = array<i64: 48, 32>}, {transform_indices = @transform_1, window_bounds = array<i64: 32, 256>}, {transform_indices = @transform_2, window_bounds = array<i64: 1, 48, 1>}, {transform_indices = @transform_3, window_bounds = array<i64: 1, 48, 1>}]} {
    %c0_i32 = arith.constant 0 : i32
    %0 = arith.cmpi eq, %arg2, %c0_i32 : i32
    %1 = arith.extui %0 : i1 to i32
    %c0_i32_0 = arith.constant 0 : i32
    %2 = arith.cmpi ne, %1, %c0_i32_0 : i32
    scf.if %2 {
      %cst_15 = arith.constant 0xFF800000 : f32
      %37 = vector.broadcast %cst_15 : f32 to vector<48x1xf32>
      %c0_16 = arith.constant 0 : index
      %c0_17 = arith.constant 0 : index
      %38 = vector.load %arg7[%c0_16, %c0_17] : memref<48x1xf32, #tpu.memory_space<vmem>>, vector<48x1xf32>
      tpu.vector_store %arg7[%c0_16, %c0_17], %37 {strides = array<i32>} : memref<48x1xf32, #tpu.memory_space<vmem>>, vector<48x1xf32>,
      %cst_18 = arith.constant 0.000000e+00 : f32
      %39 = vector.broadcast %cst_18 : f32 to vector<48x128xf32>
      %c0_19 = arith.constant 0 : index
      %c0_20 = arith.constant 0 : index
      %40 = vector.load %arg8[%c0_19, %c0_20] : memref<48x128xf32, #tpu.memory_space<vmem>>, vector<48x128xf32>
      tpu.vector_store %arg8[%c0_19, %c0_20], %39 {strides = array<i32>} : memref<48x128xf32, #tpu.memory_space<vmem>>, vector<48x128xf32>,
    } else {
    }
    %c0 = arith.constant 0 : index
    %c0_1 = arith.constant 0 : index
    %3 = vector.load %arg3[%c0, %c0_1] : memref<48x32xf32, #tpu.memory_space<vmem>>, vector<48x32xf32>
    %c0_2 = arith.constant 0 : index
    %c0_3 = arith.constant 0 : index
    %4 = vector.load %arg4[%c0_2, %c0_3] : memref<32x256xf32, #tpu.memory_space<vmem>>, vector<32x256xf32>
    %cst = arith.constant dense<0.000000e+00> : vector<48x256xf32>
    %5 = tpu.matmul %3, %4, %cst {dimension_numbers = #tpu.dot_dimension_numbers<[1], [0], [0], [1], [0, 0, 1, 1], [], []>} : vector<48x32xf32>, vector<32x256xf32>, vector<48x256xf32> -> vector<48x256xf32>
    %c2_i32 = arith.constant 2 : i32
    %6 = arith.muli %arg0, %c2_i32 : i32
    %7 = arith.addi %6, %arg2 : i32
    %8 = tpu.iota {dimensions = array<i32: 1>} : vector<48x256xi32>
    %c256_i32 = arith.constant 256 : i32
    %9 = arith.muli %7, %c256_i32 : i32
    %10 = vector.broadcast %9 : i32 to vector<48x256xi32>
    %11 = arith.addi %10, %8 : vector<48x256xi32>
    %c1000_i32 = arith.constant 1000 : i32
    %12 = vector.broadcast %c1000_i32 : i32 to vector<48x256xi32>
    %13 = arith.cmpi slt, %11, %12 : vector<48x256xi32>
    %cst_4 = arith.constant -1.000000e+30 : f32
    %14 = vector.broadcast %cst_4 : f32 to vector<48x256xf32>
    %15 = arith.select %13, %5, %14 : vector<48x256xi1>, vector<48x256xf32>
    %c0_5 = arith.constant 0 : index
    %c0_6 = arith.constant 0 : index
    %16 = vector.load %arg7[%c0_5, %c0_6] : memref<48x1xf32, #tpu.memory_space<vmem>>, vector<48x1xf32>
    %cst_7 = arith.constant dense<0xFF800000> : vector<48xf32>
    %17 = vector.multi_reduction <maximumf>, %15, %cst_7 [1] : vector<48x256xf32> to vector<48xf32>
    %18 = vector.shape_cast %17 : vector<48xf32> to vector<48x1xf32>
    %19 = arith.maximumf %16, %18 : vector<48x1xf32>
    %20 = vector.broadcast %19 : vector<48x1xf32> to vector<48x256xf32>
    %21 = arith.subf %15, %20 : vector<48x256xf32>
    %22 = math.exp %21 : vector<48x256xf32>
    %c0_8 = arith.constant 0 : index
    %c0_9 = arith.constant 0 : index
    %23 = vector.load %arg8[%c0_8, %c0_9] : memref<48x128xf32, #tpu.memory_space<vmem>>, vector<48x128xf32>
    %24 = arith.subf %16, %19 : vector<48x1xf32>
    %25 = math.exp %24 : vector<48x1xf32>
    %26 = vector.broadcast %25 : vector<48x1xf32> to vector<48x128xf32>
    %27 = arith.mulf %23, %26 : vector<48x128xf32>
    %28 = vector.extract_strided_slice %22 {offsets = [0, 0], sizes = [48, 128], strides = [1, 1]} : vector<48x256xf32> to vector<48x128xf32>
    %29 = arith.addf %27, %28 : vector<48x128xf32>
    %30 = vector.extract_strided_slice %22 {offsets = [0, 128], sizes = [48, 128], strides = [1, 1]} : vector<48x256xf32> to vector<48x128xf32>
    %31 = arith.addf %29, %30 : vector<48x128xf32>
    %c0_10 = arith.constant 0 : index
    %c0_11 = arith.constant 0 : index
    %32 = vector.load %arg8[%c0_10, %c0_11] : memref<48x128xf32, #tpu.memory_space<vmem>>, vector<48x128xf32>
    tpu.vector_store %arg8[%c0_10, %c0_11], %31 {strides = array<i32>} : memref<48x128xf32, #tpu.memory_space<vmem>>, vector<48x128xf32>,
    %c0_12 = arith.constant 0 : index
    %c0_13 = arith.constant 0 : index
    %33 = vector.load %arg7[%c0_12, %c0_13] : memref<48x1xf32, #tpu.memory_space<vmem>>, vector<48x1xf32>
    tpu.vector_store %arg7[%c0_12, %c0_13], %19 {strides = array<i32>} : memref<48x1xf32, #tpu.memory_space<vmem>>, vector<48x1xf32>,
    %c1_i32 = arith.constant 1 : i32
    %34 = arith.cmpi eq, %arg2, %c1_i32 : i32
    %35 = arith.extui %34 : i1 to i32
    %c0_i32_14 = arith.constant 0 : i32
    %36 = arith.cmpi ne, %35, %c0_i32_14 : i32
    scf.if %36 {
      %c0_15 = arith.constant 0 : index
      %c0_16 = arith.constant 0 : index
      %37 = vector.load %arg7[%c0_15, %c0_16] : memref<48x1xf32, #tpu.memory_space<vmem>>, vector<48x1xf32>
      %38 = vector.shape_cast %37 : vector<48x1xf32> to vector<1x48x1xf32>
      %c0_17 = arith.constant 0 : index
      %c0_18 = arith.constant 0 : index
      %c0_19 = arith.constant 0 : index
      %39 = vector.load %arg5[%c0_17, %c0_18, %c0_19] : memref<1x48x1xf32, #tpu.memory_space<vmem>>, vector<1x48x1xf32>
      tpu.vector_store %arg5[%c0_17, %c0_18, %c0_19], %38 {strides = array<i32>} : memref<1x48x1xf32, #tpu.memory_space<vmem>>, vector<1x48x1xf32>,
      %c0_20 = arith.constant 0 : index
      %c0_21 = arith.constant 0 : index
      %40 = vector.load %arg8[%c0_20, %c0_21] : memref<48x128xf32, #tpu.memory_space<vmem>>, vector<48x128xf32>
      %cst_22 = arith.constant dense<0.000000e+00> : vector<48xf32>
      %41 = vector.multi_reduction <add>, %40, %cst_22 [1] : vector<48x128xf32> to vector<48xf32>
      %42 = vector.shape_cast %41 : vector<48xf32> to vector<48x1xf32>
      %43 = math.log %42 : vector<48x1xf32>
      %44 = vector.shape_cast %43 : vector<48x1xf32> to vector<1x48x1xf32>
      %c0_23 = arith.constant 0 : index
      %c0_24 = arith.constant 0 : index
      %c0_25 = arith.constant 0 : index
      %45 = vector.load %arg6[%c0_23, %c0_24, %c0_25] : memref<1x48x1xf32, #tpu.memory_space<vmem>>, vector<1x48x1xf32>
      tpu.vector_store %arg6[%c0_23, %c0_24, %c0_25], %44 {strides = array<i32>} : memref<1x48x1xf32, #tpu.memory_space<vmem>>, vector<1x48x1xf32>,
    } else {
    }
    return
  }
  func.func @transform_0(%arg0: i32, %arg1: i32, %arg2: i32) -> (i32, i32) {
    %c0_i32 = arith.constant 0 : i32
    %c0_i32_0 = arith.constant 0 : i32
    return %arg1, %c0_i32 : i32, i32
  }
  func.func @transform_1(%arg0: i32, %arg1: i32, %arg2: i32) -> (i32, i32) {
    %c2_i32 = arith.constant 2 : i32
    %0 = arith.muli %arg0, %c2_i32 : i32
    %1 = arith.addi %0, %arg2 : i32
    %c0_i32 = arith.constant 0 : i32
    %c0_i32_0 = arith.constant 0 : i32
    return %c0_i32, %1 : i32, i32
  }
  func.func @transform_2(%arg0: i32, %arg1: i32, %arg2: i32) -> (i32, i32, i32) {
    %c0_i32 = arith.constant 0 : i32
    %c0_i32_0 = arith.constant 0 : i32
    return %arg0, %arg1, %c0_i32 : i32, i32, i32
  }
  func.func @transform_3(%arg0: i32, %arg1: i32, %arg2: i32) -> (i32, i32, i32) {
    %c0_i32 = arith.constant 0 : i32
    %c0_i32_0 = arith.constant 0 : i32
    return %arg0, %arg1, %c0_i32 : i32, i32, i32
  }
}

</mosaic_0001>

<bundles_post_ra>
// kernel: kge_forward.1
= control target key start
LH: loop header
LB: loop body
LE: loop exit
PB: predicated region body
PF: predicated region fallthrough
CT: control target
= control target key end

     0   :  { %s1058_s12 = smov 0   ;;  %s1060_s13 = smov 0   ;;  %s1290_s0 = inlined_call_operand.vmem [shape: f32[48,32], index: 0, kind: input, shape index: {}]   ;;  %s1291_s1 = inlined_call_operand.vmem [shape: f32[32,1024], index: 1, kind: input, shape index: {}]   ;;  %s1292_s2 = inlined_call_operand.vmem [shape: f32[2,48,1], index: 2, kind: output, shape index: {0}]   ;;  %s1293_s3 = inlined_call_operand.vmem [shape: f32[2,48,1], index: 3, kind: output, shape index: {1}]  }
   0x1   :  { %s1062_s14 = smov 0   ;;  %s1064_s15 = smov 0  }
   0x2   :  { %s1066_s16 = smov 0   ;;  %s1068_s17 = smov 0  }
   0x3   :  { %s1070_s18 = smov 0  }
   0x4 LB: > { %s26_s19 = sadd.s32 1, %s1025_s16  ;;  %s33_s20 = sadd.s32 1, %s1029_s17  ;;  %s1033_s18 = sphi %s1070_s18, %s14_s18   ;;  %s1029_s17 = sphi %s1068_s17, %s1299_s17   ;;  %s1025_s16 = sphi %s1066_s16, %s1298_s16   ;;  %s1021_s15 = sphi %s1064_s15, %s1297_s15   ;;  %s1017_s14 = sphi %s1062_s14, %s1296_s14   ;;  %s1013_s13 = sphi %s1060_s13, %s1295_s13   ;;  %s1009_s12 = sphi %s1058_s12, %s1294_s12  }
   0x5   : > { %p27_p0 = scmp.ge.s32.totalorder %s26_s19, 2  ;;  %p77_p1 = scmp.ne.s32.totalorder %s1013_s13, %s1009_s12 }
   0x6   : > { %p78_p2 = scmp.eq.s32.totalorder %s1033_s18, 0  ;;  %s828_s21 = sshll.u32 %s1029_s17, 1 }
   0x7   : > { %s1301_s19 = smov (%p27_p0, %s26_s19), 0  ;;  %s1303_s20 = smov (!%p27_p0, %s33_s20), %s1029_s17 }
   0x8   : > { %p35_p3 = scmp.ge.s32.totalorder %s1303_s20, 2  ;;  %p79_p4 = por %p78_p2, %p77_p1 }
   0x9   : > { %s64_s22 = sadd.s32 %s1025_s16, %s828_s21  ;;  %s70_s26 = sadd.s32 1, %s1013_s13 }
   0xa   : > { %s1305_s20 = smov (%p35_p3, %s1303_s20), 0  ;;  %p832_p6 = scmp.ge.s32.totalorder %s1033_s18, 4 }
   0xb   : > { %s829_s23 = sshll.u32 %s1305_s20, 1 }
   0xc   : > { %s66_s24 = sadd.s32 %s829_s23, %s1301_s19  ;;  %168 = sbr.rel (%p832_p6) target bundleno = 29 (0x1d), region = 20 }
   0xd   : > { %s67_s25 = ssub.s32 %s64_s22, %s66_s24 }
   0xe   : > { %p68_p5 = scmp.eq.s32.totalorder %s67_s25, 0 }
  0x10   : > { %s1109_s27 = scalar_select %p68_p5, %s1013_s13, %s70_s26  }
  0x11   : > { %171 = sbr.rel (!%p79_p4) target bundleno = 29 (0x1d), region = 24  ;;  %s173_s28 = sand.u32 (%p79_p4), 1, %s1013_s13  }
  0x12   : > { %s859_s29 = sshll.u32 (%p79_p4), %s64_s22, 4  ;;  %s833_s30 = sshll.u32 (%p79_p4), %s173_s28, 6 }
  0x13   : > { %s180_s6 = scalar_lea.vmem (%p79_p4), %s1291_s1, %s859_s29  ;;  %s175_s7 = scalar_lea.vmem (%p79_p4), [#allocation4], %s833_s30 }
  0x14   : > { %v193_v0 = vld [vmem:[%s180_s6] sm:$0xff] (%p79_p4)  ;;  %v195_v1 = vld [vmem:[%s180_s6 + $0x8] sm:$0xff] (%p79_p4) }
  0x15   : > { %v197_v2 = vld [vmem:[%s180_s6 + $0x40] sm:$0xff] (%p79_p4)  ;;  %194 = vst [vmem:[%s175_s7] sm:$0xff] (%p79_p4), %v193_v0  ;;  %v199_v3 = vld [vmem:[%s180_s6 + $0x48] sm:$0xff] (%p79_p4) }
  0x16   : > { %196 = vst [vmem:[%s175_s7 + $0x8] sm:$0xff] %v195_v1  ;;  %v201_v4 = vld [vmem:[%s180_s6 + $0x80] sm:$0xff]  ;;  %v203_v5 = vld [vmem:[%s180_s6 + $0x88] sm:$0xff] }
  0x17   : > { %198 = vst [vmem:[%s175_s7 + $0x10] sm:$0xff] %v197_v2  ;;  %v205_v6 = vld [vmem:[%s180_s6 + $0xc0] sm:$0xff]  ;;  %v207_v7 = vld [vmem:[%s180_s6 + $0xc8] sm:$0xff] }
  0x18   : > { %200 = vst [vmem:[%s175_s7 + $0x18] sm:$0xff] %v199_v3 }
  0x19   : > { %202 = vst [vmem:[%s175_s7 + $0x20] sm:$0xff] %v201_v4 }
  0x1a   : > { %204 = vst [vmem:[%s175_s7 + $0x28] sm:$0xff] %v203_v5 }
  0x1b   : > { %206 = vst [vmem:[%s175_s7 + $0x30] sm:$0xff] %v205_v6 }
  0x1c   : > { %208 = vst [vmem:[%s175_s7 + $0x38] sm:$0xff] %v207_v7 }
  0x1d PF: > { %p837_p7 = scmp.ge.s32.totalorder %s1033_s18, 1  ;;  %p213_p8 = scmp.lt.s32.totalorder %s1033_s18, 5 }
  0x1f   : > { %p214_p9 = pnand %p837_p7, %p213_p8 }
  0x20   : > { %s220_s8 = sand.u32 (!%p214_p9), 1, %s1009_s12   ;;  %p271_p10 = scmp.lt.s32.totalorder (!%p214_p9), %s1021_s15, 1 }
  0x21   : > { %217 = sbr.rel (%p214_p9) target bundleno = 606 (0x25e), region = 47  ;;  %s838_s9 = sshll.u32 (!%p214_p9), %s220_s8, 6 }
  0x22   : > { %s1131_s28 = scalar_lea.vmem (!%p214_p9), [#allocation4], %s838_s9  ;;  %p841_p11 = scmp.ne.s32.totalorder (!%p214_p9), %s1017_s14, 0 }
  0x26   : > { %s272_s10 = scalar_select %p271_p10, %s1021_s15, 1 }
  0x27   : > { %293 = sbr.rel (%p841_p11) target bundleno = 57 (0x39), region = 55 }
  0x28   : > { %s868_s11 = smul.u32 48, %s272_s10 }
  0x2a   : > { %s1124_s23 = scalar_lea.vmem %s1292_s2, %s868_s11  ;;  %s1129_s26 = scalar_lea.vmem %s1293_s3, %s868_s11 }
  0x2c   : > { %vm294_vm0 = vcmask 7168   ;;  %v1035_v8 = vmov -inf   ;;  %v1036_v9 = vmov 0.0  }
  0x2d   : > { %295 = vst.msk [vmem:[#allocation2] sm:$0xff] %vm294_vm0, %v1035_v8 }
  0x2e   : > { %296 = vst.msk [vmem:[#allocation2 + $0x8] sm:$0xff] %vm294_vm0, %v1035_v8 }
  0x2f   : > { %297 = vst.msk [vmem:[#allocation2 + $0x10] sm:$0xff] %vm294_vm0, %v1035_v8 }
  0x30   : > { %298 = vst.msk [vmem:[#allocation2 + $0x18] sm:$0xff] %vm294_vm0, %v1035_v8 }
  0x31   : > { %299 = vst.msk [vmem:[#allocation2 + $0x20] sm:$0xff] %vm294_vm0, %v1035_v8 }
  0x32   : > { %300 = vst.msk [vmem:[#allocation2 + $0x28] sm:$0xff] %vm294_vm0, %v1035_v8 }
  0x33   : > { %301 = vst [vmem:[#allocation3 + $0x28] sm:$0xff] %v1036_v9 }
  0x34   : > { %302 = vst [vmem:[#allocation3 + $0x10] sm:$0xff] %v1036_v9 }
  0x35   : > { %303 = vst [vmem:[#allocation3 + $0x8] sm:$0xff] %v1036_v9 }
  0x36   : > { %304 = vst [vmem:[#allocation3] sm:$0xff] %v1036_v9 }
  0x37   : > { %305 = vst [vmem:[#allocation3 + $0x18] sm:$0xff] %v1036_v9 }
  0x38   : > { %306 = vst [vmem:[#allocation3 + $0x20] sm:$0xff] %v1036_v9 }
  0x39 PF: > { %v319_v10 = vld [vmem:[%s1131_s28 + $0x30] sm:$0xff]  ;;  %v320_v11 = vld [vmem:[%s1131_s28 + $0x38] sm:$0xff]  ;;  %v317_v12 = vld [vmem:[%s1131_s28 + $0x20] sm:$0xff]  ;;  %vm321_vm1 = vcmask 261120   ;;  %s854_s22 = sshll.u32 %s1021_s15, 1  ;;  %v412_v24 = vlaneseq  ;;  %v1037_v60 = vmov 0  }
  0x3a   : > { %352 = vmatpush.msra.mxu0 %v319_v10  ;;  %860 = vmatpush.msra.mxu2 %v319_v10  ;;  %v318_v13 = vld [vmem:[%s1131_s28 + $0x28] sm:$0xff]  ;;  %v315_v14 = vld [vmem:[%s1131_s28 + $0x10] sm:$0xff]  ;;  %v316_v15 = vld [vmem:[%s1131_s28 + $0x18] sm:$0xff]  ;;  %s411_s24 = sadd.s32 %s1017_s14, %s854_s22  ;;  %vm607_vm4 = vcmask 7168   ;;  %p856_p12 = scmp.ne.s32.totalorder %s1017_s14, 1 }
  0x3b   : > { %387 = vmatpush.msra.mxu1 %v320_v11  ;;  %864 = vmatpush.msra.mxu3 %v320_v11  ;;  %v313_v16 = vld [vmem:[%s1131_s28] sm:$0xff]  ;;  %v314_v17 = vld [vmem:[%s1131_s28 + $0x8] sm:$0xff]  ;;  %v310_v19 = vld [vmem:[%s1290_s0 + $0x18] sm:$0xff]  ;;  %v413_v25 = vand.u32 127, %v412_v24  ;;  %s855_s25 = sshll.u32 %s411_s24, 8 }
  0x3c   : > { %353 = vmatpush.msra.mxu0 %v317_v12  ;;  %861 = vmatpush.msra.mxu2 %v317_v12  ;;  %v307_v18 = vld [vmem:[%s1290_s0] sm:$0xff]  ;;  %v308_v20 = vld [vmem:[%s1290_s0 + $0x8] sm:$0xff]  ;;  %v309_v22 = vld [vmem:[%s1290_s0 + $0x10] sm:$0xff]  ;;  %v416_v26 = vstv %s855_s25 }
  0x3d   : > { %388 = vmatpush.msra.mxu1 %v318_v13  ;;  %865 = vmatpush.msra.mxu3 %v318_v13  ;;  %v311_v21 = vld [vmem:[%s1290_s0 + $0x20] sm:$0xff]  ;;  %v312_v23 = vld [vmem:[%s1290_s0 + $0x28] sm:$0xff]  ;;  %v414_v27 = vadd.s32 128, %v413_v25  ;;  %v417_v28 = vadd.s32 %v416_v26, %v413_v25  ;;  %v436_v0 = vld [vmem:[#allocation2 + $0x18] sm:$0xff] }
  0x3e   : > { %354 = vmatpush.msra.mxu0 %v315_v14  ;;  %862 = vmatpush.msra.mxu2 %v315_v14  ;;  %v433_v61 = vld [vmem:[#allocation2] sm:$0xff]  ;;  %v434_v2 = vld [vmem:[#allocation2 + $0x8] sm:$0xff]  ;;  %v435_v11 = vld [vmem:[#allocation2 + $0x10] sm:$0xff] }
  0x3f   : > { %389 = vmatpush.msra.mxu1 %v316_v15  ;;  %866 = vmatpush.msra.mxu3 %v316_v15  ;;  %v418_v29 = vadd.s32 %v416_v26, %v414_v27  ;;  %vm419_vm2 = vcmp.lt.s32.totalorder %v417_v28, 1000  ;;  %v437_v8 = vld [vmem:[#allocation2 + $0x20] sm:$0xff] }
  0x40   : > { %355 = vmatpush.msra.mxu0 %v313_v16  ;;  %863 = vmatpush.msra.mxu2 %v313_v16 }
  0x41   : > { %390 = vmatpush.msra.mxu1 %v314_v17  ;;  %867 = vmatpush.msra.mxu3 %v314_v17  ;;  %vm420_vm3 = vcmp.lt.s32.totalorder %v418_v29, 1000 }
  0x42   : > { %842 = vmatmul.msk.f32.vlgmr.msra.gmra.mxu0 %vm321_vm1, %v307_v18  ;;  %845 = vmatmul.msk.f32.vlgmr.msra.gmra.mxu2 %vm321_vm1, %v310_v19 }
  0x43   : > { %848 = vmatmul.msk.f32.vlgmr.msra.gmra.mxu1 %vm321_vm1, %v307_v18  ;;  %851 = vmatmul.msk.f32.vlgmr.msra.gmra.mxu3 %vm321_vm1, %v310_v19 }
  0x44   : > { %928 = vset.pattern.permute.xlu0 %v1037_v60  ;;  %929 = vset.pattern.permute.xlu2 %v1037_v60 }
  0x45   : > { %930 = vset.pattern.permute.xlu1 %v1037_v60 }
  0x4a   : > { %843 = vmatmul.msk.f32.gmra.mxu0 %vm321_vm1, %v308_v20  ;;  %846 = vmatmul.msk.f32.gmra.mxu2 %vm321_vm1, %v311_v21 }
  0x4b   : > { %849 = vmatmul.msk.f32.gmra.mxu1 %vm321_vm1, %v308_v20  ;;  %852 = vmatmul.msk.f32.gmra.mxu3 %vm321_vm1, %v311_v21  ;;  %v438_v20 = vld [vmem:[#allocation2 + $0x28] sm:$0xff] }
  0x52   : > { %844 = vmatmul.msk.f32.gmra.mxu0 %vm321_vm1, %v309_v22  ;;  %847 = vmatmul.msk.f32.gmra.mxu2 %vm321_vm1, %v312_v23 }
  0x53   : > { %850 = vmatmul.msk.f32.gmra.mxu1 %vm321_vm1, %v309_v22  ;;  %853 = vmatmul.msk.f32.gmra.mxu3 %vm321_vm1, %v312_v23 }
  0xbf   : > { %v357_v30 = vpop.f32.mrf.mxu0 }
  0xc0   : > { %v1175_v31 = vsel %vm419_vm2, %v357_v30, -1e+30  ;;  %v392_v32 = vpop.f32.mrf.mxu1 }
  0xc1   : > { %v1178_v33 = vsel %vm420_vm3, %v392_v32, -1e+30 }
  0xc2   : > { %v439_v34 = vmax.f32 %v1175_v31, %v1178_v33 }
  0xc4   : > { %440 = vmax.xlane.f32.xlu0 %v439_v34 }
  0xc5   : > { %v366_v35 = vpop.f32.mrf.mxu2 }
  0xc6   : > { %v1183_v36 = vsel %vm419_vm2, %v366_v35, -1e+30  ;;  %v401_v37 = vpop.f32.mrf.mxu3 }
  0xc7   : > { %v1186_v38 = vsel %vm420_vm3, %v401_v37, -1e+30  ;;  %v360_v39 = vpop.f32.mrf.mxu0 }
  0xc8   : > { %v1189_v40 = vsel %vm419_vm2, %v360_v39, -1e+30  ;;  %v395_v41 = vpop.f32.mrf.mxu1  ;;  %v448_v42 = vmax.f32 %v1183_v36, %v1186_v38 }
  0xc9   : > { %v1194_v43 = vsel %vm420_vm3, %v395_v41, -1e+30 }
  0xca   : > { %449 = vmax.xlane.f32.xlu1 %v448_v42  ;;  %v442_v44 = vmax.f32 %v1189_v40, %v1194_v43 }
  0xcc   : > { %443 = vmax.xlane.f32.xlu0 %v442_v44 }
  0xcd   : > { %v369_v45 = vpop.f32.mrf.mxu2 }
  0xce   : > { %v1199_v46 = vsel %vm419_vm2, %v369_v45, -1e+30  ;;  %v404_v47 = vpop.f32.mrf.mxu3 }
  0xcf   : > { %v363_v48 = vpop.f32.mrf.mxu0  ;;  %v1202_v49 = vsel %vm420_vm3, %v404_v47, -1e+30 }
  0xd0   : > { %v1205_v50 = vsel %vm419_vm2, %v363_v48, -1e+30  ;;  %v398_v51 = vpop.f32.mrf.mxu1  ;;  %v451_v52 = vmax.f32 %v1199_v46, %v1202_v49 }
  0xd1   : > { %v1210_v53 = vsel %vm420_vm3, %v398_v51, -1e+30  ;;  %v531_v51 = vld [vmem:[#allocation3 + $0x8] sm:$0xff] }
  0xd2   : > { %452 = vmax.xlane.f32.xlu2 %v451_v52  ;;  %v445_v54 = vmax.f32 %v1205_v50, %v1210_v53 }
  0xd4   : > { %446 = vmax.xlane.f32.xlu1 %v445_v54 }
  0xd5   : > { %v372_v55 = vpop.f32.mrf.mxu2 }
  0xd6   : > { %v1215_v56 = vsel %vm419_vm2, %v372_v55, -1e+30  ;;  %v407_v57 = vpop.f32.mrf.mxu3 }
  0xd7   : > { %v1218_v58 = vsel %vm420_vm3, %v407_v57, -1e+30 }
  0xd8   : > { %v454_v59 = vmax.f32 %v1215_v56, %v1218_v58 }
  0xda   : > { %455 = vmax.xlane.f32.xlu2 %v454_v59 }
 0x137   : > { %v441_v62 = vpop.xlane.xlu0 %440 }
 0x138   : > { %v457_v63 = vmax.f32 %v433_v61, %v441_v62 }
 0x13a   : > { %608 = vst.msk [vmem:[#allocation2] sm:$0xff] %vm607_vm4, %v457_v63  ;;  %465 = vperm.xlu0 %928, %v457_v63   ;;  %v535_v7 = vsub.f32 %v433_v61, %v457_v63 }
 0x13c   : > { %v541_v13 = vmul.f32 1.442695, %v535_v7 }
 0x13d   : > { %v450_v1 = vpop.xlane.xlu1 %449 }
 0x13e   : > { %v460_v3 = vmax.f32 %v436_v0, %v450_v1 }
 0x13f   : > { %v444_v4 = vpop.xlane.xlu0 %443 }
 0x140   : > { %611 = vst.msk [vmem:[#allocation2 + $0x18] sm:$0xff] %vm607_vm4, %v460_v3  ;;  %v458_v5 = vmax.f32 %v434_v2, %v444_v4  ;;  %480 = vperm.xlu2 %929, %v460_v3   ;;  %v538_v19 = vsub.f32 %v436_v0, %v460_v3  ;;  %v534_v3 = vld [vmem:[#allocation3 + $0x20] sm:$0xff] }
 0x142   : > { %v536_v6 = vsub.f32 %v434_v2, %v458_v5  ;;  %609 = vst.msk [vmem:[#allocation2 + $0x8] sm:$0xff] %vm607_vm4, %v458_v5  ;;  %470 = vperm.xlu1 %930, %v458_v5   ;;  %v547_v25 = vmul.f32 1.442695, %v538_v19 }
 0x144   : > { %v543_v9 = vmul.f32 1.442695, %v536_v6 }
 0x145   : > { %v453_v10 = vpop.xlane.xlu2 %452 }
 0x146   : > { %931 = vpow2.f32 %v543_v9  ;;  %v461_v12 = vmax.f32 %v437_v8, %v453_v10 }
 0x147   : > { %v447_v14 = vpop.xlane.xlu1 %446  ;;  %933 = vpow2.f32 %v541_v13 }
 0x148   : > { %v539_v15 = vsub.f32 %v437_v8, %v461_v12  ;;  %612 = vst.msk [vmem:[#allocation2 + $0x20] sm:$0xff] %vm607_vm4, %v461_v12  ;;  %v459_v16 = vmax.f32 %v435_v11, %v447_v14  ;;  %v530_v8 = vld [vmem:[#allocation3 + $0x10] sm:$0xff] }
 0x14a   : > { %v549_v17 = vmul.f32 1.442695, %v539_v15  ;;  %v537_v18 = vsub.f32 %v435_v11, %v459_v16  ;;  %610 = vst.msk [vmem:[#allocation2 + $0x10] sm:$0xff] %vm607_vm4, %v459_v16  ;;  %485 = vperm.xlu1 %930, %v461_v12   ;;  %475 = vperm.xlu2 %929, %v459_v16  }
 0x14c   : > { %v932_v21 = vpop.eup %931  ;;  %935 = vpow2.f32 %v549_v17  ;;  %v545_v22 = vmul.f32 1.442695, %v537_v18  ;;  %v529_v18 = vld [vmem:[#allocation3 + $0x28] sm:$0xff] }
 0x14d   : > { %560 = vperm.xlu0 %928, %v932_v21   ;;  %v456_v23 = vpop.xlane.xlu2 %455  ;;  %v934_v26 = vpop.eup %933 }
 0x14e   : > { %v462_v24 = vmax.f32 %v438_v20, %v456_v23  ;;  %937 = vpow2.f32 %v545_v22 }
 0x14f   : > { %939 = vpow2.f32 %v547_v25 }
 0x150   : > { %613 = vst.msk [vmem:[#allocation2 + $0x28] sm:$0xff] %vm607_vm4, %v462_v24  ;;  %v540_v27 = vsub.f32 %v438_v20, %v462_v24 }
 0x152   : > { %v936_v28 = vpop.eup %935  ;;  %555 = vperm.xlu1 %930, %v934_v26   ;;  %490 = vperm.xlu2 %929, %v462_v24   ;;  %v551_v29 = vmul.f32 1.442695, %v540_v27 }
 0x154   : > { %v938_v30 = vpop.eup %937  ;;  %941 = vpow2.f32 %v551_v29 }
 0x155   : > { %575 = vperm.xlu0 %928, %v936_v28   ;;  %v940_v32 = vpop.eup %939 }
 0x15a   : > { %570 = vperm.xlu1 %930, %v940_v32   ;;  %565 = vperm.xlu2 %929, %v938_v30   ;;  %v942_v34 = vpop.eup %941 }
 0x162   : > { %580 = vperm.xlu2 %929, %v942_v34   ;;  %v532_v34 = vld [vmem:[#allocation3] sm:$0xff] }
 0x19a   : > { %v1228_v35 = vpop.permute.xlu2 %480 }
 0x19b   : > { %v499_v13 = vsub.f32 %v1183_v36, %v1228_v35  ;;  %v533_v36 = vld [vmem:[#allocation3 + $0x18] sm:$0xff] }
 0x19d   : > { %v517_v20 = vmul.f32 1.442695, %v499_v13 }
 0x1a4   : > { %v476_v37 = vpop.permute.xlu2 %475 }
 0x1a5   : > { %v497_v39 = vsub.f32 %v1205_v50, %v476_v37  ;;  %v498_v41 = vsub.f32 %v1210_v53, %v476_v37 }
 0x1a7   : > { %v513_v42 = vmul.f32 1.442695, %v497_v39  ;;  %v515_v45 = vmul.f32 1.442695, %v498_v41 }
 0x1a9   : > { %943 = vpow2.f32 %v513_v42 }
 0x1aa   : > { %945 = vpow2.f32 %v515_v45 }
 0x1ac   : > { %v491_v44 = vpop.permute.xlu2 %490  ;;  %v466_v57 = vpop.permute.xlu0 %465 }
 0x1ad   : > { %v503_v47 = vsub.f32 %v1215_v56, %v491_v44  ;;  %v504_v48 = vsub.f32 %v1218_v58, %v491_v44  ;;  %v493_v56 = vsub.f32 %v1175_v31, %v466_v57  ;;  %v494_v2 = vsub.f32 %v1178_v33, %v466_v57 }
 0x1af   : > { %v525_v52 = vmul.f32 1.442695, %v503_v47  ;;  %v944_v53 = vpop.eup %943  ;;  %v527_v61 = vmul.f32 1.442695, %v504_v48  ;;  %v505_v4 = vmul.f32 1.442695, %v493_v56 }
 0x1b0   : > { %v946_v0 = vpop.eup %945  ;;  %v507_v9 = vmul.f32 1.442695, %v494_v2 }
 0x1b1   : > { %947 = vpow2.f32 %v525_v52 }
 0x1b2   : > { %949 = vpow2.f32 %v527_v61 }
 0x1b4   : > { %v566_v54 = vpop.permute.xlu2 %565  ;;  %v471_v55 = vpop.permute.xlu1 %470 }
 0x1b5   : > { %v585_v59 = vmul.f32 %v566_v54, %v531_v51  ;;  %v495_v60 = vsub.f32 %v1189_v40, %v471_v55  ;;  %v496_v50 = vsub.f32 %v1194_v43, %v471_v55 }
 0x1b7   : > { %v591_v62 = vadd.f32 %v944_v53, %v585_v59  ;;  %v509_v63 = vmul.f32 1.442695, %v495_v60  ;;  %v511_v58 = vmul.f32 1.442695, %v496_v50  ;;  %v948_v31 = vpop.eup %947 }
 0x1b8   : > { %v950_v33 = vpop.eup %949 }
 0x1b9   : > { %v597_v1 = vadd.f32 %v946_v0, %v591_v62  ;;  %951 = vpow2.f32 %v509_v63 }
 0x1ba   : > { %953 = vpow2.f32 %v511_v58 }
 0x1bb   : > { %603 = vst [vmem:[#allocation3 + $0x8] sm:$0xff] %v597_v1  ;;  %955 = vpow2.f32 %v505_v4 }
 0x1bc   : > { %v581_v40 = vpop.permute.xlu2 %580  ;;  %v486_v5 = vpop.permute.xlu1 %485  ;;  %957 = vpow2.f32 %v507_v9 }
 0x1bd   : > { %v588_v43 = vmul.f32 %v581_v40, %v534_v3  ;;  %v501_v6 = vsub.f32 %v1199_v46, %v486_v5  ;;  %v502_v7 = vsub.f32 %v1202_v49, %v486_v5  ;;  %v500_v46 = vsub.f32 %v1186_v38, %v1228_v35 }
 0x1bf   : > { %v594_v10 = vadd.f32 %v948_v31, %v588_v43  ;;  %v521_v11 = vmul.f32 1.442695, %v501_v6  ;;  %v561_v12 = vpop.permute.xlu0 %560  ;;  %v952_v15 = vpop.eup %951  ;;  %v523_v17 = vmul.f32 1.442695, %v502_v7  ;;  %v519_v25 = vmul.f32 1.442695, %v500_v46 }
 0x1c0   : > { %v584_v14 = vmul.f32 %v561_v12, %v530_v8  ;;  %v954_v19 = vpop.eup %953 }
 0x1c1   : > { %v600_v16 = vadd.f32 %v950_v33, %v594_v10  ;;  %959 = vpow2.f32 %v521_v11  ;;  %v956_v24 = vpop.eup %955 }
 0x1c2   : > { %v590_v49 = vadd.f32 %v952_v15, %v584_v14  ;;  %961 = vpow2.f32 %v523_v17  ;;  %v958_v28 = vpop.eup %957 }
 0x1c3   : > { %606 = vst [vmem:[#allocation3 + $0x20] sm:$0xff] %v600_v16  ;;  %963 = vpow2.f32 %v517_v20 }
 0x1c4   : > { %v596_v21 = vadd.f32 %v954_v19, %v590_v49  ;;  %v556_v22 = vpop.permute.xlu1 %555  ;;  %965 = vpow2.f32 %v519_v25 }
 0x1c5   : > { %v583_v23 = vmul.f32 %v556_v22, %v529_v18 }
 0x1c6   : > { %602 = vst [vmem:[#allocation3 + $0x10] sm:$0xff] %v596_v21 }
 0x1c7   : > { %v589_v26 = vadd.f32 %v956_v24, %v583_v23  ;;  %v576_v27 = vpop.permute.xlu0 %575  ;;  %v960_v29 = vpop.eup %959 }
 0x1c8   : > { %v587_v38 = vmul.f32 %v576_v27, %v533_v36  ;;  %v962_v35 = vpop.eup %961 }
 0x1c9   : > { %v595_v30 = vadd.f32 %v958_v28, %v589_v26  ;;  %v964_v42 = vpop.eup %963 }
 0x1ca   : > { %v593_v32 = vadd.f32 %v960_v29, %v587_v38  ;;  %v966_v45 = vpop.eup %965 }
 0x1cb   : > { %601 = vst [vmem:[#allocation3 + $0x28] sm:$0xff] %v595_v30 }
 0x1cc   : > { %v599_v37 = vadd.f32 %v962_v35, %v593_v32  ;;  %v571_v39 = vpop.permute.xlu1 %570 }
 0x1cd   : > { %v586_v41 = vmul.f32 %v571_v39, %v532_v34 }
 0x1ce   : > { %605 = vst [vmem:[#allocation3 + $0x18] sm:$0xff] %v599_v37 }
 0x1cf   : > { %v592_v44 = vadd.f32 %v964_v42, %v586_v41  ;;  %617 = sbr.rel (%p856_p12) target bundleno = 606 (0x25e), region = 59 }
 0x1d1   : > { %v598_v47 = vadd.f32 %v966_v45, %v592_v44 }
 0x1d3   : > { %604 = vst [vmem:[#allocation3] sm:$0xff] %v598_v47 }
 0x1d4   : > { %v632_v51 = vld [vmem:[#allocation3 + $0x8] sm:$0xff]  ;;  %v635_v54 = vld [vmem:[#allocation3 + $0x20] sm:$0xff]  ;;  %v631_v57 = vld [vmem:[#allocation3 + $0x10] sm:$0xff] }
 0x1d5   : > { %v634_v48 = vld [vmem:[#allocation3 + $0x18] sm:$0xff]  ;;  %v630_v52 = vld [vmem:[#allocation3 + $0x28] sm:$0xff]  ;;  %640 = vadd.xlane.f32.xlu1 %v632_v51  ;;  %v618_v59 = vld [vmem:[#allocation2] sm:$0xff] }
 0x1d6   : > { %644 = vadd.xlane.f32.xlu2 %v634_v48  ;;  %636 = vadd.xlane.f32.xlu0 %v630_v52  ;;  %v619_v60 = vld [vmem:[#allocation2 + $0x8] sm:$0xff]  ;;  %v620_v50 = vld [vmem:[#allocation2 + $0x10] sm:$0xff]  ;;  %v621_v53 = vld [vmem:[#allocation2 + $0x18] sm:$0xff]  ;;  %624 = vst.msk [vmem:[%s1124_s23] sm:$0xff] %vm607_vm4, %v618_v59 }
 0x1d7   : > { %v622_v61 = vld [vmem:[#allocation2 + $0x20] sm:$0xff]  ;;  %625 = vst.msk [vmem:[%s1124_s23 + $0x8] sm:$0xff] %vm607_vm4, %v619_v60  ;;  %v623_v62 = vld [vmem:[#allocation2 + $0x28] sm:$0xff] }
 0x1d8   : > { %626 = vst.msk [vmem:[%s1124_s23 + $0x10] sm:$0xff] %vm607_vm4, %v620_v50 }
 0x1d9   : > { %627 = vst.msk [vmem:[%s1124_s23 + $0x18] sm:$0xff] %vm607_vm4, %v621_v53 }
 0x1da   : > { %v633_v55 = vld [vmem:[#allocation3] sm:$0xff]  ;;  %628 = vst.msk [vmem:[%s1124_s23 + $0x20] sm:$0xff] %vm607_vm4, %v622_v61 }
 0x1db   : > { %629 = vst.msk [vmem:[%s1124_s23 + $0x28] sm:$0xff] %vm607_vm4, %v623_v62 }
 0x1dd   : > { %642 = vadd.xlane.f32.xlu1 %v633_v55 }
 0x1de   : > { %646 = vadd.xlane.f32.xlu2 %v635_v54  ;;  %638 = vadd.xlane.f32.xlu0 %v631_v57 }
 0x248   : > { %v641_v0 = vpop.xlane.xlu1 %640 }
 0x249   : > { %v645_v63 = vpop.xlane.xlu2 %644  ;;  %v637_v56 = vpop.xlane.xlu0 %636 }
 0x24a   : > { %967 = vlog2.f32 %v645_v63 }
 0x24b   : > { %969 = vlog2.f32 %v641_v0 }
 0x24c   : > { %971 = vlog2.f32 %v637_v56 }
 0x250   : > { %v968_v1 = vpop.eup %967  ;;  %v643_v4 = vpop.xlane.xlu1 %642 }
 0x251   : > { %v970_v58 = vpop.eup %969  ;;  %v657_v2 = vmul.f32 0.6931472, %v968_v1  ;;  %v647_v3 = vpop.xlane.xlu2 %646 }
 0x252   : > { %v972_v40 = vpop.eup %971  ;;  %v653_v5 = vmul.f32 0.6931472, %v970_v58  ;;  %973 = vlog2.f32 %v647_v3  ;;  %v639_v43 = vpop.xlane.xlu0 %638 }
 0x253   : > { %664 = vst.msk [vmem:[%s1129_s26 + $0x20] sm:$0xff] %vm607_vm4, %v657_v2  ;;  %v649_v6 = vmul.f32 0.6931472, %v972_v40  ;;  %975 = vlog2.f32 %v643_v4 }
 0x254   : > { %662 = vst.msk [vmem:[%s1129_s26 + $0x10] sm:$0xff] %vm607_vm4, %v653_v5  ;;  %977 = vlog2.f32 %v639_v43 }
 0x255   : > { %660 = vst.msk [vmem:[%s1129_s26] sm:$0xff] %vm607_vm4, %v649_v6 }
 0x258   : > { %v974_v7 = vpop.eup %973 }
 0x259   : > { %v976_v8 = vpop.eup %975  ;;  %v659_v31 = vmul.f32 0.6931472, %v974_v7 }
 0x25a   : > { %v978_v9 = vpop.eup %977  ;;  %v655_v10 = vmul.f32 0.6931472, %v976_v8 }
 0x25b   : > { %665 = vst.msk [vmem:[%s1129_s26 + $0x28] sm:$0xff] %vm607_vm4, %v659_v31  ;;  %v651_v11 = vmul.f32 0.6931472, %v978_v9 }
 0x25c   : > { %663 = vst.msk [vmem:[%s1129_s26 + $0x18] sm:$0xff] %vm607_vm4, %v655_v10 }
 0x25d   : > { %661 = vst.msk [vmem:[%s1129_s26 + $0x8] sm:$0xff] %vm607_vm4, %v651_v11 }
 0x25e PF: > { %s14_s18 = sadd.s32 1, %s1033_s18   ;;  %s1294_s12 = smov %s1013_s13 }
 0x25f   : > { %p11_p13 = scmp.ge.s32.totalorder %s14_s18, 6   ;;  %s1295_s13 = smov %s1109_s27 }
 0x260   : > { %s1296_s14 = smov %s1025_s16  ;;  %s1297_s15 = smov %s1029_s17 }
 0x261   : > { %s1298_s16 = smov %s1301_s19  ;;  %s1299_s17 = smov %s1305_s20 }
 0x262   :  { %13 = sbr.rel (!%p11_p13) target bundleno = 4 (0x4), region = 109 }

</bundles_post_ra>
